<compile_context>
chip_gen: v7x
topology: tpu7x:2x2x1
jax: 0.10.0
libtpu: 0.0.40
codegen_flags: <defaults>
</compile_context>

<pallas_src>
import functools

import jax
import jax.numpy as jnp
import numpy as np
from jax.experimental import pallas as pl
from jax.experimental.pallas import tpu as pltpu

# ----------------------------- configuration -------------------------------
B, L, N = 2, 8, 4          # batch, temporal length, nodes
D_MODEL = 32               # feature dim (conv in-channels)
D_SKIP = 32                # skip_conv out-channels (== d_model, feeds LayerNorm)
NUM_LAYERS = 3
EPS = 1e-5
MAX_PACKED_TILE = 1024     # packed rows per grid step (multiple of 16)


def _round_up(v, m):
    return ((v + m - 1) // m) * m


def _block_diag_pack(w, pack):
    """kron(I_pack, w) for a stack of matrices w: (..., d, d) -> (..., pack*d, pack*d)."""
    eye = jnp.eye(pack, dtype=w.dtype)
    d_in, d_out = w.shape[-2], w.shape[-1]
    out = jnp.einsum('pq,...ij->...piqj', eye, w)
    return out.reshape(*w.shape[:-2], pack * d_in, pack * d_out)


def _vmem_limit_bytes(tmp_rows, dp, num_layers, compute_dtype, out_dtype):
    """Scoped-VMEM budget with 2x headroom (defaults are 16 MiB on v5e and
    32 MiB on v6e/v7x; v7x physical VMEM per core is only 64 MiB)."""
    cds = np.dtype(compute_dtype).itemsize
    ods = np.dtype(out_dtype).itemsize
    act = tmp_rows * dp
    est = 2 * act * cds                  # x tile, double-buffered
    est += 2 * act * ods                 # out tile, double-buffered
    est += num_layers * act * cds        # activation slab scratch
    est += 8 * act * 4                   # f32 epilogue temporaries
    w_bytes = (2 * num_layers + 1) * dp * dp * cds + (num_layers + 3) * dp * 4
    est += 2 * w_bytes                   # resident params (default double-buffered)
    return int(min(max(2 * est, 16 * 2**20), 48 * 2**20))


# ------------------------------ Pallas kernel -------------------------------
def _encoder_skip_kernel(x_ref, wl_ref, bl_ref, ws_ref, bs_ref,
                         gamma_ref, beta_ref, avg_ref, out_ref, slab_ref,
                         *, num_layers, eps):
    """One packed row-tile of the full encoder-with-skip forward.

    Packed layout: each row holds PACK logical rows side by side on the lane
    axis, so every matmul below is lane-dense (last dim a multiple of 128).

    x_ref     : (TMP, DP)                  packed activation tile (compute dtype)
    wl_ref    : (num_layers, DP, DP)       per-layer block-diag dense W
    bl_ref    : (num_layers, 1, DP)        per-layer bias (lane-tiled, f32)
    ws_ref    : (num_layers*DP, DP)        fused block-diag skip-conv W
    bs_ref    : (1, DP)                    skip biases, pre-summed (f32)
    gamma_ref, beta_ref : (1, DP)          LayerNorm affine (lane-tiled, f32)
    avg_ref   : (DP, DP)                   block-averaging matrix (compute dtype)
    out_ref   : (TMP, DP)
    slab_ref  : (TMP, num_layers*DP)       VMEM scratch holding all layer acts
    """
    cdt = wl_ref.dtype                     # MXU operand dtype (bf16 or f32)
    dp = x_ref.shape[-1]
    x = x_ref[...]

    # Per-layer dense + ReLU; each activation goes straight into its 128-lane
    # slice of the slab scratch (no acts list, no end-of-loop concatenate).
    for l in range(num_layers):            # num_layers is small & static
        h = jnp.dot(x, wl_ref[l], preferred_element_type=jnp.float32) + bl_ref[l]
        x = jnp.maximum(h, 0.0).astype(cdt)
        slab_ref[:, l * dp:(l + 1) * dp] = x

    # Fused skip: one K = num_layers*DP matmul instead of num_layers small ones.
    skip = jnp.dot(slab_ref[...], ws_ref[...],
                   preferred_element_type=jnp.float32) + bs_ref[...]

    # x = norm(relu(skip)); per-D-feature-group stats via block-avg matmuls.
    # var = E[r^2] - mean^2: both stat matmuls depend only on r, so they issue
    # back-to-back (no serial mean->center->square->matmul chain).  Post-ReLU
    # values are O(1) and accumulation is f32, so the uncentered form is safe.
    r = jnp.maximum(skip, 0.0)
    mean = jnp.dot(r.astype(cdt), avg_ref[...], preferred_element_type=jnp.float32)
    msq = jnp.dot((r * r).astype(cdt), avg_ref[...],
                  preferred_element_type=jnp.float32)
    var = jnp.maximum(msq - mean * mean, 0.0)
    out = (r - mean) * jax.lax.rsqrt(var + eps) * gamma_ref[...] + beta_ref[...]
    out_ref[...] = out.astype(out_ref.dtype)


# --------------------------- parameter packing ------------------------------
def pack_polla_params(w_layers, b_layers, w_skip, b_skip, gamma, beta,
                      *, compute_dtype=jnp.bfloat16, lane_pack=128):
    """One-time packing of the module parameters for the Pallas kernel.

    Call this once (e.g. at model load) and reuse the result for every forward
    call; it hoists the block-diag kron / bias tiling out of the hot path.

    compute_dtype : MXU operand dtype. bf16 is recommended on v5e/v6e/v7x
                    (all MXUs are bf16-native); f32 is multi-pass.
    lane_pack     : 128 by default. 256 is an optional v6e-only bf16 experiment
                    (matches the 256-wide MXU); keep 128 on v5e and v7x.
    """
    num_layers, d_model, _ = w_layers.shape
    d_skip = w_skip.shape[-1]
    if d_skip != d_model:
        raise ValueError("LayerNorm feature dim (d_skip) must equal d_model for "
                         "the lane-packed layout")
    if lane_pack % 128 != 0 or lane_pack % d_model != 0 or d_model > lane_pack:
        # Fail loudly rather than silently falling back to a masked
        # (partial-store) 32-lane layout.
        raise ValueError(
            f"lane-dense packing requires d_model ({d_model}) to divide "
            f"lane_pack ({lane_pack}) and lane_pack to be a multiple of 128")
    pack = lane_pack // d_model
    dp = lane_pack

    wl_p = _block_diag_pack(w_layers, pack).astype(compute_dtype)         # (Ly,dp,dp)
    ws_p = _block_diag_pack(w_skip, pack).reshape(num_layers * dp, dp)    # (Ly*dp,dp)
    ws_p = ws_p.astype(compute_dtype)
    bl_p = jnp.tile(b_layers, (1, 1, pack)).astype(jnp.float32)           # (Ly,1,dp)
    bs_p = jnp.tile(b_skip.sum(axis=0), (1, pack)).astype(jnp.float32)    # (1,dp)
    gamma_p = jnp.tile(gamma, (1, pack)).astype(jnp.float32)              # (1,dp)
    beta_p = jnp.tile(beta, (1, pack)).astype(jnp.float32)                # (1,dp)
    avg = jnp.kron(jnp.eye(pack, dtype=jnp.float32),
                   jnp.full((d_model, d_model), 1.0 / d_model, jnp.float32))
    avg = avg.astype(compute_dtype)                                       # (dp,dp)

    return dict(wl=wl_p, bl=bl_p, ws=ws_p, bs=bs_p, gamma=gamma_p, beta=beta_p,
                avg=avg, pack=pack, dp=dp, num_layers=num_layers,
                d_model=d_model, d_skip=d_skip, compute_dtype=compute_dtype)


# ------------------------------- wrapper -------------------------------------
def polla_encoder_skip(x, params, *, eps=EPS, out_dtype=None):
    """x: (B, L, N, d_model) -> (B, L, N, d_skip).

    params    : output of pack_polla_params (packed once, reused every call).
    out_dtype : output dtype; pass jnp.bfloat16 to halve output HBM traffic if
                the consumer tolerates it (default: x.dtype).
    """
    Bx, Lx, Nx, D = x.shape
    assert D == params["d_model"], (D, params["d_model"])
    pack, dp, num_layers = params["pack"], params["dp"], params["num_layers"]
    cdt = params["compute_dtype"]
    out_dtype = x.dtype if out_dtype is None else out_dtype

    m = Bx * Lx * Nx
    mp = pl.cdiv(m, pack)                         # packed rows needed
    if mp <= MAX_PACKED_TILE:
        tmp_rows = _round_up(mp, 16)              # single grid step (toy sizes)
    else:
        # Guarantee >= 2 "parallel" grid steps so both v7x TensorCores get work;
        # on v5e/v6e the grid is a serial loop, so each step just stays as big
        # as the VMEM budget comfortably allows (~85% of HBM roofline).
        tmp_rows = min(MAX_PACKED_TILE, _round_up(pl.cdiv(mp, 2), 16))
    mp_pad = _round_up(mp, tmp_rows)
    m_pad = mp_pad * pack

    x2d = x.reshape(m, D)
    if m_pad != m:
        # Padded rows run relu(bias) + LayerNorm on zeros and are sliced off
        # below; nothing downstream reduces over them.
        x2d = jnp.pad(x2d, ((0, m_pad - m), (0, 0)))
    xp = x2d.reshape(mp_pad, dp).astype(cdt)      # zero-cost row-major packing

    kernel = functools.partial(_encoder_skip_kernel,
                               num_layers=num_layers, eps=eps)
    grid = (mp_pad // tmp_rows,)
    vmem_limit = _vmem_limit_bytes(tmp_rows, dp, num_layers, cdt, out_dtype)

    out = pl.pallas_call(
        kernel,
        out_shape=jax.ShapeDtypeStruct((mp_pad, dp), out_dtype),
        grid_spec=pltpu.PrefetchScalarGridSpec(
            num_scalar_prefetch=0,
            grid=grid,
            in_specs=[
                pl.BlockSpec((tmp_rows, dp), lambda i: (i, 0)),       # x tile
                # Constant index maps keep the parameters logically resident
                # across grid steps.
                # TODO(synk): pipeline_mode=pl.Buffered(1) (or a one-shot manual
                #             DMA into scratch) would drop their redundant
                #             second buffer (~0.5 MiB); omitted here to keep the
                #             lowering maximally portable across generations.
                pl.BlockSpec(params["wl"].shape, lambda i: (0, 0, 0)),
                pl.BlockSpec(params["bl"].shape, lambda i: (0, 0, 0)),
                pl.BlockSpec(params["ws"].shape, lambda i: (0, 0)),
                pl.BlockSpec(params["bs"].shape, lambda i: (0, 0)),
                pl.BlockSpec(params["gamma"].shape, lambda i: (0, 0)),
                pl.BlockSpec(params["beta"].shape, lambda i: (0, 0)),
                pl.BlockSpec(params["avg"].shape, lambda i: (0, 0)),
            ],
            out_specs=pl.BlockSpec((tmp_rows, dp), lambda i: (i, 0)),
            scratch_shapes=[pltpu.VMEM((tmp_rows, num_layers * dp), cdt)],
        ),
        compiler_params=pltpu.CompilerParams(
            dimension_semantics=("parallel",),
            vmem_limit_bytes=vmem_limit),
    )(xp, params["wl"], params["bl"], params["ws"], params["bs"],
      params["gamma"], params["beta"], params["avg"])

    out2d = out.reshape(m_pad, D)[:m]             # free row-major un-packing
    return out2d.reshape(Bx, Lx, Nx, D)


# --------------------------- pure-JAX reference -----------------------------
def reference_forward(x, w_layers, b_layers, w_skip, b_skip, gamma, beta):
    Bx, Lx, Nx, D = x.shape
    h = x.reshape(-1, D).astype(jnp.float32)
    skip = jnp.zeros((h.shape[0], w_skip.shape[-1]), jnp.float32)
    for l in range(w_layers.shape[0]):
        h = jnp.maximum(h @ w_layers[l] + b_layers[l, 0], 0.0)
        skip = skip + h @ w_skip[l] + b_skip[l, 0]
    r = jnp.maximum(skip, 0.0)
    mean = r.mean(-1, keepdims=True)
    var = ((r - mean) ** 2).mean(-1, keepdims=True)
    out = (r - mean) / jnp.sqrt(var + EPS) * gamma[0] + beta[0]
    return out.reshape(Bx, Lx, Nx, -1).astype(x.dtype)


# ---------------------------------- main ------------------------------------
if __name__ == "__main__":
    key = jax.random.PRNGKey(0)
    kx, kw, kb, kws, kbs = jax.random.split(key, 5)

    x = jax.random.normal(kx, (B, L, N, D_MODEL), jnp.float32)

    # Deterministic synthetic parameters (the module __init__ only stores the
    # layer / skip_conv / norm submodules; shapes follow the layout above).
    w_layers = jax.random.normal(kw, (NUM_LAYERS, D_MODEL, D_MODEL),
                                 jnp.float32) * (1.0 / jnp.sqrt(D_MODEL))
    b_layers = jax.random.normal(kb, (NUM_LAYERS, 1, D_MODEL),
                                 jnp.float32) * 0.01
    w_skip = jax.random.normal(kws, (NUM_LAYERS, D_MODEL, D_SKIP),
                               jnp.float32) * (1.0 / jnp.sqrt(D_MODEL))
    b_skip = jax.random.normal(kbs, (NUM_LAYERS, 1, D_SKIP),
                               jnp.float32) * 0.01
    gamma = jnp.ones((1, D_SKIP), jnp.float32)
    beta = jnp.zeros((1, D_SKIP), jnp.float32)

    ref = reference_forward(x, w_layers, b_layers, w_skip, b_skip, gamma, beta)

    # (1) f32 MXU-operand path: tight correctness check vs. the reference.
    params_f32 = pack_polla_params(w_layers, b_layers, w_skip, b_skip,
                                   gamma, beta, compute_dtype=jnp.float32)
    out = polla_encoder_skip(x, params_f32)
    out = jax.block_until_ready(out)
    assert out.shape == (B, L, N, D_SKIP), out.shape
    np.testing.assert_allclose(np.asarray(out), np.asarray(ref),
                               rtol=1e-4, atol=1e-4)

    # (2) default bf16 MXU-operand path (recommended on v5e/v6e/v7x), bf16
    #     output to halve writeback traffic — now validated (loose tolerance).
    params_bf16 = pack_polla_params(w_layers, b_layers, w_skip, b_skip,
                                    gamma, beta)   # compute_dtype=bf16 default
    out_bf16 = polla_encoder_skip(x, params_bf16, out_dtype=jnp.bfloat16)
    out_bf16 = jax.block_until_ready(out_bf16)
    np.testing.assert_allclose(np.asarray(jnp.asarray(out_bf16, jnp.float32)),
                               np.asarray(ref), rtol=1e-1, atol=1e-1)

    print("KERNEL_OK")
</pallas_src>

<mosaic_0001>
module attributes {stable_mosaic.version = 11 : i64} {
  func.func @_encoder_skip_kernel(%arg0: i32, %arg1: memref<16x128xf32, #tpu.memory_space<vmem>>, %arg2: memref<3x128x128xf32, #tpu.memory_space<vmem>>, %arg3: memref<3x1x128xf32, #tpu.memory_space<vmem>>, %arg4: memref<384x128xf32, #tpu.memory_space<vmem>>, %arg5: memref<1x128xf32, #tpu.memory_space<vmem>>, %arg6: memref<1x128xf32, #tpu.memory_space<vmem>>, %arg7: memref<1x128xf32, #tpu.memory_space<vmem>>, %arg8: memref<128x128xf32, #tpu.memory_space<vmem>>, %arg9: memref<16x128xf32, #tpu.memory_space<vmem>>, %arg10: memref<16x384xf32, #tpu.memory_space<vmem>>) attributes {dimension_semantics = [#tpu.dimension_semantics<parallel>], iteration_bounds = array<i64: 1>, scalar_prefetch = 0 : i64, scratch_operands = 1 : i64, tpu.core_type = #tpu.core_type<tc>, window_params = [{transform_indices = @transform_0, window_bounds = array<i64: 16, 128>}, {pipeline_mode = #tpu.pipeline_mode<synchronous>, transform_indices = @transform_1, window_bounds = array<i64: 3, 128, 128>}, {pipeline_mode = #tpu.pipeline_mode<synchronous>, transform_indices = @transform_2, window_bounds = array<i64: 3, 1, 128>}, {pipeline_mode = #tpu.pipeline_mode<synchronous>, transform_indices = @transform_3, window_bounds = array<i64: 384, 128>}, {pipeline_mode = #tpu.pipeline_mode<synchronous>, transform_indices = @transform_4, window_bounds = array<i64: 1, 128>}, {pipeline_mode = #tpu.pipeline_mode<synchronous>, transform_indices = @transform_5, window_bounds = array<i64: 1, 128>}, {pipeline_mode = #tpu.pipeline_mode<synchronous>, transform_indices = @transform_6, window_bounds = array<i64: 1, 128>}, {pipeline_mode = #tpu.pipeline_mode<synchronous>, transform_indices = @transform_7, window_bounds = array<i64: 128, 128>}, {transform_indices = @transform_8, window_bounds = array<i64: 16, 128>}]} {
    %c0 = arith.constant 0 : index
    %c0_0 = arith.constant 0 : index
    %0 = vector.load %arg1[%c0, %c0_0] : memref<16x128xf32, #tpu.memory_space<vmem>>, vector<16x128xf32>
    %c0_1 = arith.constant 0 : index
    %c0_2 = arith.constant 0 : index
    %c0_3 = arith.constant 0 : index
    %1 = vector.load %arg2[%c0_1, %c0_2, %c0_3] : memref<3x128x128xf32, #tpu.memory_space<vmem>>, vector<1x128x128xf32>
    %2 = vector.shape_cast %1 : vector<1x128x128xf32> to vector<128x128xf32>
    %cst = arith.constant dense<0.000000e+00> : vector<16x128xf32>
    %3 = tpu.matmul %0, %2, %cst {dimension_numbers = #tpu.dot_dimension_numbers<[1], [0], [0], [1], [0, 0, 1, 1], [], []>} : vector<16x128xf32>, vector<128x128xf32>, vector<16x128xf32> -> vector<16x128xf32>
    %c0_4 = arith.constant 0 : index
    %c0_5 = arith.constant 0 : index
    %c0_6 = arith.constant 0 : index
    %4 = vector.load %arg3[%c0_4, %c0_5, %c0_6] : memref<3x1x128xf32, #tpu.memory_space<vmem>>, vector<1x1x128xf32>
    %5 = vector.shape_cast %4 : vector<1x1x128xf32> to vector<1x128xf32>
    %6 = vector.broadcast %5 : vector<1x128xf32> to vector<16x128xf32>
    %7 = arith.addf %3, %6 : vector<16x128xf32>
    %cst_7 = arith.constant 0.000000e+00 : f32
    %8 = vector.broadcast %cst_7 : f32 to vector<16x128xf32>
    %9 = arith.maximumf %7, %8 : vector<16x128xf32>
    %c0_8 = arith.constant 0 : index
    %c0_9 = arith.constant 0 : index
    %10 = vector.load %arg10[%c0_8, %c0_9] : memref<16x384xf32, #tpu.memory_space<vmem>>, vector<16x128xf32>
    tpu.vector_store %arg10[%c0_8, %c0_9], %9 {strides = array<i32>} : memref<16x384xf32, #tpu.memory_space<vmem>>, vector<16x128xf32>,
    %c1 = arith.constant 1 : index
    %c0_10 = arith.constant 0 : index
    %c0_11 = arith.constant 0 : index
    %11 = vector.load %arg2[%c1, %c0_10, %c0_11] : memref<3x128x128xf32, #tpu.memory_space<vmem>>, vector<1x128x128xf32>
    %12 = vector.shape_cast %11 : vector<1x128x128xf32> to vector<128x128xf32>
    %cst_12 = arith.constant dense<0.000000e+00> : vector<16x128xf32>
    %13 = tpu.matmul %9, %12, %cst_12 {dimension_numbers = #tpu.dot_dimension_numbers<[1], [0], [0], [1], [0, 0, 1, 1], [], []>} : vector<16x128xf32>, vector<128x128xf32>, vector<16x128xf32> -> vector<16x128xf32>
    %c1_13 = arith.constant 1 : index
    %c0_14 = arith.constant 0 : index
    %c0_15 = arith.constant 0 : index
    %14 = vector.load %arg3[%c1_13, %c0_14, %c0_15] : memref<3x1x128xf32, #tpu.memory_space<vmem>>, vector<1x1x128xf32>
    %15 = vector.shape_cast %14 : vector<1x1x128xf32> to vector<1x128xf32>
    %16 = vector.broadcast %15 : vector<1x128xf32> to vector<16x128xf32>
    %17 = arith.addf %13, %16 : vector<16x128xf32>
    %cst_16 = arith.constant 0.000000e+00 : f32
    %18 = vector.broadcast %cst_16 : f32 to vector<16x128xf32>
    %19 = arith.maximumf %17, %18 : vector<16x128xf32>
    %c0_17 = arith.constant 0 : index
    %c128 = arith.constant 128 : index
    %20 = vector.load %arg10[%c0_17, %c128] : memref<16x384xf32, #tpu.memory_space<vmem>>, vector<16x128xf32>
    tpu.vector_store %arg10[%c0_17, %c128], %19 {strides = array<i32>} : memref<16x384xf32, #tpu.memory_space<vmem>>, vector<16x128xf32>,
    %c2 = arith.constant 2 : index
    %c0_18 = arith.constant 0 : index
    %c0_19 = arith.constant 0 : index
    %21 = vector.load %arg2[%c2, %c0_18, %c0_19] : memref<3x128x128xf32, #tpu.memory_space<vmem>>, vector<1x128x128xf32>
    %22 = vector.shape_cast %21 : vector<1x128x128xf32> to vector<128x128xf32>
    %cst_20 = arith.constant dense<0.000000e+00> : vector<16x128xf32>
    %23 = tpu.matmul %19, %22, %cst_20 {dimension_numbers = #tpu.dot_dimension_numbers<[1], [0], [0], [1], [0, 0, 1, 1], [], []>} : vector<16x128xf32>, vector<128x128xf32>, vector<16x128xf32> -> vector<16x128xf32>
    %c2_21 = arith.constant 2 : index
    %c0_22 = arith.constant 0 : index
    %c0_23 = arith.constant 0 : index
    %24 = vector.load %arg3[%c2_21, %c0_22, %c0_23] : memref<3x1x128xf32, #tpu.memory_space<vmem>>, vector<1x1x128xf32>
    %25 = vector.shape_cast %24 : vector<1x1x128xf32> to vector<1x128xf32>
    %26 = vector.broadcast %25 : vector<1x128xf32> to vector<16x128xf32>
    %27 = arith.addf %23, %26 : vector<16x128xf32>
    %cst_24 = arith.constant 0.000000e+00 : f32
    %28 = vector.broadcast %cst_24 : f32 to vector<16x128xf32>
    %29 = arith.maximumf %27, %28 : vector<16x128xf32>
    %c0_25 = arith.constant 0 : index
    %c256 = arith.constant 256 : index
    %30 = vector.load %arg10[%c0_25, %c256] : memref<16x384xf32, #tpu.memory_space<vmem>>, vector<16x128xf32>
    tpu.vector_store %arg10[%c0_25, %c256], %29 {strides = array<i32>} : memref<16x384xf32, #tpu.memory_space<vmem>>, vector<16x128xf32>,
    %c0_26 = arith.constant 0 : index
    %c0_27 = arith.constant 0 : index
    %31 = vector.load %arg10[%c0_26, %c0_27] : memref<16x384xf32, #tpu.memory_space<vmem>>, vector<16x384xf32>
    %c0_28 = arith.constant 0 : index
    %c0_29 = arith.constant 0 : index
    %32 = vector.load %arg4[%c0_28, %c0_29] : memref<384x128xf32, #tpu.memory_space<vmem>>, vector<384x128xf32>
    %cst_30 = arith.constant dense<0.000000e+00> : vector<16x128xf32>
    %33 = tpu.matmul %31, %32, %cst_30 {dimension_numbers = #tpu.dot_dimension_numbers<[1], [0], [0], [1], [0, 0, 1, 1], [], []>} : vector<16x384xf32>, vector<384x128xf32>, vector<16x128xf32> -> vector<16x128xf32>
    %c0_31 = arith.constant 0 : index
    %c0_32 = arith.constant 0 : index
    %34 = vector.load %arg5[%c0_31, %c0_32] : memref<1x128xf32, #tpu.memory_space<vmem>>, vector<1x128xf32>
    %35 = vector.broadcast %34 : vector<1x128xf32> to vector<16x128xf32>
    %36 = arith.addf %33, %35 : vector<16x128xf32>
    %cst_33 = arith.constant 0.000000e+00 : f32
    %37 = vector.broadcast %cst_33 : f32 to vector<16x128xf32>
    %38 = arith.maximumf %36, %37 : vector<16x128xf32>
    %c0_34 = arith.constant 0 : index
    %c0_35 = arith.constant 0 : index
    %39 = vector.load %arg8[%c0_34, %c0_35] : memref<128x128xf32, #tpu.memory_space<vmem>>, vector<128x128xf32>
    %cst_36 = arith.constant dense<0.000000e+00> : vector<16x128xf32>
    %40 = tpu.matmul %38, %39, %cst_36 {dimension_numbers = #tpu.dot_dimension_numbers<[1], [0], [0], [1], [0, 0, 1, 1], [], []>} : vector<16x128xf32>, vector<128x128xf32>, vector<16x128xf32> -> vector<16x128xf32>
    %41 = arith.mulf %38, %38 : vector<16x128xf32>
    %c0_37 = arith.constant 0 : index
    %c0_38 = arith.constant 0 : index
    %42 = vector.load %arg8[%c0_37, %c0_38] : memref<128x128xf32, #tpu.memory_space<vmem>>, vector<128x128xf32>
    %cst_39 = arith.constant dense<0.000000e+00> : vector<16x128xf32>
    %43 = tpu.matmul %41, %42, %cst_39 {dimension_numbers = #tpu.dot_dimension_numbers<[1], [0], [0], [1], [0, 0, 1, 1], [], []>} : vector<16x128xf32>, vector<128x128xf32>, vector<16x128xf32> -> vector<16x128xf32>
    %44 = arith.mulf %40, %40 : vector<16x128xf32>
    %45 = arith.subf %43, %44 : vector<16x128xf32>
    %cst_40 = arith.constant 0.000000e+00 : f32
    %46 = vector.broadcast %cst_40 : f32 to vector<16x128xf32>
    %47 = arith.maximumf %45, %46 : vector<16x128xf32>
    %48 = arith.subf %38, %40 : vector<16x128xf32>
    %cst_41 = arith.constant 9.99999974E-6 : f32
    %49 = vector.broadcast %cst_41 : f32 to vector<16x128xf32>
    %50 = arith.addf %47, %49 : vector<16x128xf32>
    %51 = math.rsqrt %50 : vector<16x128xf32>
    %52 = arith.mulf %48, %51 : vector<16x128xf32>
    %c0_42 = arith.constant 0 : index
    %c0_43 = arith.constant 0 : index
    %53 = vector.load %arg6[%c0_42, %c0_43] : memref<1x128xf32, #tpu.memory_space<vmem>>, vector<1x128xf32>
    %54 = vector.broadcast %53 : vector<1x128xf32> to vector<16x128xf32>
    %55 = arith.mulf %52, %54 : vector<16x128xf32>
    %c0_44 = arith.constant 0 : index
    %c0_45 = arith.constant 0 : index
    %56 = vector.load %arg7[%c0_44, %c0_45] : memref<1x128xf32, #tpu.memory_space<vmem>>, vector<1x128xf32>
    %57 = vector.broadcast %56 : vector<1x128xf32> to vector<16x128xf32>
    %58 = arith.addf %55, %57 : vector<16x128xf32>
    %c0_46 = arith.constant 0 : index
    %c0_47 = arith.constant 0 : index
    %59 = vector.load %arg9[%c0_46, %c0_47] : memref<16x128xf32, #tpu.memory_space<vmem>>, vector<16x128xf32>
    tpu.vector_store %arg9[%c0_46, %c0_47], %58 {strides = array<i32>} : memref<16x128xf32, #tpu.memory_space<vmem>>, vector<16x128xf32>,
    return
  }
  func.func @transform_0(%arg0: i32) -> (i32, i32) {
    %c0_i32 = arith.constant 0 : i32
    %c0_i32_0 = arith.constant 0 : i32
    return %arg0, %c0_i32 : i32, i32
  }
  func.func @transform_1(%arg0: i32) -> (i32, i32, i32) {
    %c0_i32 = arith.constant 0 : i32
    %c0_i32_0 = arith.constant 0 : i32
    %c0_i32_1 = arith.constant 0 : i32
    %c0_i32_2 = arith.constant 0 : i32
    return %c0_i32, %c0_i32_0, %c0_i32_1 : i32, i32, i32
  }
  func.func @transform_2(%arg0: i32) -> (i32, i32, i32) {
    %c0_i32 = arith.constant 0 : i32
    %c0_i32_0 = arith.constant 0 : i32
    %c0_i32_1 = arith.constant 0 : i32
    %c0_i32_2 = arith.constant 0 : i32
    return %c0_i32, %c0_i32_0, %c0_i32_1 : i32, i32, i32
  }
  func.func @transform_3(%arg0: i32) -> (i32, i32) {
    %c0_i32 = arith.constant 0 : i32
    %c0_i32_0 = arith.constant 0 : i32
    %c0_i32_1 = arith.constant 0 : i32
    return %c0_i32, %c0_i32_0 : i32, i32
  }
  func.func @transform_4(%arg0: i32) -> (i32, i32) {
    %c0_i32 = arith.constant 0 : i32
    %c0_i32_0 = arith.constant 0 : i32
    %c0_i32_1 = arith.constant 0 : i32
    return %c0_i32, %c0_i32_0 : i32, i32
  }
  func.func @transform_5(%arg0: i32) -> (i32, i32) {
    %c0_i32 = arith.constant 0 : i32
    %c0_i32_0 = arith.constant 0 : i32
    %c0_i32_1 = arith.constant 0 : i32
    return %c0_i32, %c0_i32_0 : i32, i32
  }
  func.func @transform_6(%arg0: i32) -> (i32, i32) {
    %c0_i32 = arith.constant 0 : i32
    %c0_i32_0 = arith.constant 0 : i32
    %c0_i32_1 = arith.constant 0 : i32
    return %c0_i32, %c0_i32_0 : i32, i32
  }
  func.func @transform_7(%arg0: i32) -> (i32, i32) {
    %c0_i32 = arith.constant 0 : i32
    %c0_i32_0 = arith.constant 0 : i32
    %c0_i32_1 = arith.constant 0 : i32
    return %c0_i32, %c0_i32_0 : i32, i32
  }
  func.func @transform_8(%arg0: i32) -> (i32, i32) {
    %c0_i32 = arith.constant 0 : i32
    %c0_i32_0 = arith.constant 0 : i32
    return %arg0, %c0_i32 : i32, i32
  }
}

</mosaic_0001>

<bundles_post_ra>
// kernel: tpu_custom_call.1
= control target key start
LH: loop header
LB: loop body
LE: loop exit
PB: predicated region body
PF: predicated region fallthrough
CT: control target
= control target key end

     0   :  { %13 = vsyncpa [#allocation4], 0  ;;  %s1721_s0 = inlined_call_operand.hbm [shape: f32[16,128], index: 0, kind: input, shape index: {}]   ;;  %s1722_s1 = inlined_call_operand.hbm [shape: f32[3,128,128], index: 1, kind: input, shape index: {}]   ;;  %s1723_s2 = inlined_call_operand.vmem [shape: f32[3,1,128], index: 2, kind: input, shape index: {}]   ;;  %s1724_s3 = inlined_call_operand.hbm [shape: f32[384,128], index: 3, kind: input, shape index: {}]   ;;  %s1725_s4 = inlined_call_operand.vmem [shape: f32[1,128], index: 4, kind: input, shape index: {}]   ;;  %s1726_s5 = inlined_call_operand.vmem [shape: f32[1,128], index: 5, kind: input, shape index: {}]   ;;  %s1727_s6 = inlined_call_operand.vmem [shape: f32[1,128], index: 6, kind: input, shape index: {}]   ;;  %s1728_s7 = inlined_call_operand.hbm [shape: f32[128,128], index: 7, kind: input, shape index: {}]   ;;  %s1729_s8 = inlined_call_operand.hbm [shape: f32[16,128], index: 8, kind: output, shape index: {}]  }
   0x1   :  { %14 = vsyncpa [#allocation7], 0 }
   0x2   :  { %15 = vsyncpa [#allocation10], 0 }
   0x3   :  { %16 = vsyncpa [#allocation5], 0  ;;  %s1548_s27 = smov [#allocation6]   ;;  %s1549_s29 = smov [#allocation3]  }
   0x4   :  { %s34_s28 = sshll.u32 %s1548_s27, 4  ;;  %s22_s30 = sshll.u32 %s1549_s29, 4  ;;  %s35_s28 = int_to_ptr.vmem [resolvable:$true] %s34_s28  ;;  %s1600_s30 = int_to_ptr.vmem [resolvable:$true] %s22_s30 }
   0x5   :  { %s1430_s11 = scalar_lea.hbm %s1722_s1, 6144 }
   0x6   :  { %p1431_p0 = scmp.ne.s32.totalorder %s1722_s1, %s1430_s11  ;;  %p1434_p1 = scmp.lt.u32.totalorder %s1430_s11, %s1722_s1 }
   0x8   :  { %p1436_p2 = pnand %p1434_p1, %p1431_p0 }
   0xa   :  { %1439 = shalt.err (!%p1436_p2)
}
   0xb   :  { %s1440_s16 = scalar_lea.vmem %s35_s28, 6144  ;;  %p1445_p4 = scmp.lt.s32.totalorder %s35_s28, %s35_s28 }
   0xc   :  { %p1441_p3 = scmp.ne.s32.totalorder %s35_s28, %s1440_s16  ;;  %p1446_p5 = scmp.lt.s32.totalorder %s1440_s16, %s1440_s16 }
   0xe   :  { %p1447_p6 = por %p1446_p5, %p1445_p4 }
  0x10   :  { %p1448_p7 = pnand %p1447_p6, %p1441_p3 }
  0x12   :  { %1451 = shalt.err (!%p1448_p7)
}
  0x13   :  { %s1550_s17 = smov 128   ;;  %s1551_s18 = smov 8  }
  0x14   :  { %40 = dma.hbm_to_vmem [thread:$0]  %s1722_s1, 6144, %s35_s28, [#allocation7], %s1550_s17, %s1550_s17, %s1551_s18  }
  0x15   :  { %s1452_s23 = scalar_lea.hbm %s1721_s0, 256 }
  0x16   :  { %p1453_p8 = scmp.ne.s32.totalorder %s1721_s0, %s1452_s23  ;;  %p1456_p9 = scmp.lt.u32.totalorder %s1452_s23, %s1721_s0 }
  0x18   :  { %p1458_p10 = pnand %p1456_p9, %p1453_p8 }
  0x1a   :  { %1461 = shalt.err (!%p1458_p10)
}
  0x1b   :  { %s1462_s29 = scalar_lea.vmem %s1600_s30, 256  ;;  %p1467_p12 = scmp.lt.s32.totalorder %s1600_s30, %s1600_s30 }
  0x1c   :  { %p1463_p11 = scmp.ne.s32.totalorder %s1600_s30, %s1462_s29  ;;  %p1468_p13 = scmp.lt.s32.totalorder %s1462_s29, %s1462_s29 }
  0x1e   :  { %p1469_p0 = por %p1468_p13, %p1467_p12 }
  0x20   :  { %p1470_p1 = pnand %p1469_p0, %p1463_p11 }
  0x22   :  { %1473 = shalt.err (!%p1470_p1)
}
  0x23   :  { %28 = dma.hbm_to_vmem [thread:$0]  %s1721_s0, 256, %s1600_s30, [#allocation4], %s1550_s17, %s1550_s17, %s1551_s18  }
  0x24   :  { %s1552_s9 = smov [#allocation8]   ;;  %s1553_s11 = smov [#allocation9]  }
  0x25   :  { %s48_s10 = sshll.u32 %s1552_s9, 4  ;;  %s66_s12 = sshll.u32 %s1553_s11, 4  ;;  %s49_s10 = int_to_ptr.vmem [resolvable:$true] %s48_s10  ;;  %s1637_s12 = int_to_ptr.vmem [resolvable:$true] %s66_s12 }
  0x26   :  { %s1474_s15 = scalar_lea.hbm %s1724_s3, 6144 }
  0x27   :  { %p1475_p2 = scmp.ne.s32.totalorder %s1724_s3, %s1474_s15  ;;  %p1478_p3 = scmp.lt.u32.totalorder %s1474_s15, %s1724_s3 }
  0x29   :  { %p1480_p4 = pnand %p1478_p3, %p1475_p2 }
  0x2b   :  { %1483 = shalt.err (!%p1480_p4)
}
  0x2c   :  { %s1484_s0 = scalar_lea.vmem %s49_s10, 6144  ;;  %p1489_p6 = scmp.lt.s32.totalorder %s49_s10, %s49_s10 }
  0x2d   :  { %p1485_p5 = scmp.ne.s32.totalorder %s49_s10, %s1484_s0  ;;  %p1490_p7 = scmp.lt.s32.totalorder %s1484_s0, %s1484_s0 }
  0x2f   :  { %p1491_p8 = por %p1490_p7, %p1489_p6 }
  0x31   :  { %p1492_p9 = pnand %p1491_p8, %p1485_p5 }
  0x33   :  { %1495 = shalt.err (!%p1492_p9)
}
  0x34   :  { %54 = dma.hbm_to_vmem [thread:$0]  %s1724_s3, 6144, %s49_s10, [#allocation7], %s1550_s17, %s1550_s17, %s1551_s18  }
  0x35   :  { %s1496_s25 = scalar_lea.hbm %s1728_s7, 2048 }
  0x36   :  { %p1497_p10 = scmp.ne.s32.totalorder %s1728_s7, %s1496_s25  ;;  %p1500_p11 = scmp.lt.u32.totalorder %s1496_s25, %s1728_s7 }
  0x38   :  { %p1502_p12 = pnand %p1500_p11, %p1497_p10 }
  0x3a   :  { %1505 = shalt.err (!%p1502_p12)
}
  0x3b   :  { %s1506_s28 = scalar_lea.vmem %s1637_s12, 2048  ;;  %p1511_p0 = scmp.lt.s32.totalorder %s1637_s12, %s1637_s12 }
  0x3c   :  { %p1507_p13 = scmp.ne.s32.totalorder %s1637_s12, %s1506_s28  ;;  %p1512_p1 = scmp.lt.s32.totalorder %s1506_s28, %s1506_s28 }
  0x3e   :  { %p1513_p2 = por %p1512_p1, %p1511_p0 }
  0x40   :  { %p1514_p3 = pnand %p1513_p2, %p1507_p13 }
  0x42   :  { %1517 = shalt.err (!%p1514_p3)
}
  0x43   :  { %72 = dma.hbm_to_vmem [thread:$0]  %s1728_s7, 2048, %s1637_s12, [#allocation10], %s1550_s17, %s1550_s17, %s1551_s18  }
  0x44   :  { %1540 = dma.done.wait [#allocation4], 256  }
  0x45   :  { %1541 = vsyncadd [#allocation4], 4294967040 }
  0x46   :  { %1542 = dma.done.wait [#allocation7], 12288  }
  0x47   :  { %1543 = vsyncadd [#allocation7], 4294955008 }
  0x48   :  { %1544 = dma.done.wait [#allocation10], 2048  }
  0x49   :  { %1545 = vsyncadd [#allocation10], 4294965248  ;;  %v87_v0 = vld [vmem:[#allocation6] sm:$0xff]  ;;  %v88_v1 = vld [vmem:[#allocation6 + $0x8] sm:$0xff]  ;;  %s1554_s21 = smov [#allocation11]  }
  0x4a   :  { %v89_v2 = vld [vmem:[#allocation6 + $0x10] sm:$0xff]  ;;  %v1195_v3 = vpack.c.bf16 %v88_v1, %v87_v0  ;;  %v90_v4 = vld [vmem:[#allocation6 + $0x18] sm:$0xff]  ;;  %v91_v6 = vld [vmem:[#allocation6 + $0x20] sm:$0xff]  ;;  %s817_s0 = sshll.u32 %s1554_s21, 4  ;;  %s818_s0 = int_to_ptr.vmem [resolvable:$true] %s817_s0 }
  0x4b   :  { %v1199_v5 = vpack.c.bf16 %v90_v4, %v89_v2  ;;  %v92_v7 = vld [vmem:[#allocation6 + $0x28] sm:$0xff]  ;;  %v93_v9 = vld [vmem:[#allocation6 + $0x30] sm:$0xff]  ;;  %v94_v10 = vld [vmem:[#allocation6 + $0x38] sm:$0xff]  ;;  %s1518_s30 = scalar_lea.vmem %s818_s0, 256  ;;  %p1523_p5 = scmp.lt.s32.totalorder %s818_s0, %s818_s0 }
  0x4c   :  { %1196 = vmatprep.subr.bf16.mxu0 %v1195_v3  ;;  %v1203_v8 = vpack.c.bf16 %v92_v7, %v91_v6  ;;  %v85_v11 = vld [vmem:[#allocation3] sm:$0xff]  ;;  %v190_v12 = vld [vmem:[#allocation6 + $0x80] sm:$0xff]  ;;  %v191_v13 = vld [vmem:[#allocation6 + $0x88] sm:$0xff]  ;;  %v1207_v20 = vpack.c.bf16 %v94_v10, %v93_v9  ;;  %p1519_p4 = scmp.ne.s32.totalorder %s818_s0, %s1518_s30  ;;  %p1524_p6 = scmp.lt.s32.totalorder %s1518_s30, %s1518_s30 }
  0x4d   :  { %1198 = vmatpush3.bf16.msra.mxu0 %v1195_v3  ;;  %1017 = vmatprep.mubr.f32.mxu0 %v85_v11  ;;  %v192_v14 = vld [vmem:[#allocation6 + $0x90] sm:$0xff]  ;;  %v1227_v15 = vpack.c.bf16 %v191_v13, %v190_v12  ;;  %v193_v16 = vld [vmem:[#allocation6 + $0x98] sm:$0xff]  ;;  %v194_v18 = vld [vmem:[#allocation6 + $0xa0] sm:$0xff] }
  0x4e   :  { %1200 = vmatprep.subr.bf16.mxu0 %v1199_v5  ;;  %v1231_v17 = vpack.c.bf16 %v193_v16, %v192_v14  ;;  %v195_v19 = vld [vmem:[#allocation6 + $0xa8] sm:$0xff]  ;;  %v95_v21 = vld [vmem:[#allocation6 + $0x40] sm:$0xff]  ;;  %v196_v24 = vld [vmem:[#allocation6 + $0xb0] sm:$0xff]  ;;  %p1525_p7 = por %p1524_p6, %p1523_p5 }
  0x4f   :  { %1228 = vmatprep.subr.bf16.mxu1 %v1227_v15  ;;  %v96_v22 = vld [vmem:[#allocation6 + $0x48] sm:$0xff]  ;;  %v1235_v23 = vpack.c.bf16 %v195_v19, %v194_v18  ;;  %v197_v25 = vld [vmem:[#allocation6 + $0xb8] sm:$0xff]  ;;  %v97_v27 = vld [vmem:[#allocation6 + $0x50] sm:$0xff] }
  0x50   :  { %1230 = vmatpush3.bf16.msra.mxu1 %v1227_v15  ;;  %v1211_v26 = vpack.c.bf16 %v96_v22, %v95_v21  ;;  %v98_v28 = vld [vmem:[#allocation6 + $0x58] sm:$0xff]  ;;  %v1239_v29 = vpack.c.bf16 %v197_v25, %v196_v24  ;;  %v198_v30 = vld [vmem:[#allocation6 + $0xc0] sm:$0xff]  ;;  %v199_v31 = vld [vmem:[#allocation6 + $0xc8] sm:$0xff]  ;;  %p1526_p8 = pnand %p1525_p7, %p1519_p4 }
  0x51   :  { %1202 = vmatpush3.bf16.msra.mxu0 %v1199_v5  ;;  %1232 = vmatprep.subr.bf16.mxu1 %v1231_v17  ;;  %v1215_v32 = vpack.c.bf16 %v98_v28, %v97_v27  ;;  %v99_v33 = vld [vmem:[#allocation6 + $0x60] sm:$0xff]  ;;  %v100_v34 = vld [vmem:[#allocation6 + $0x68] sm:$0xff]  ;;  %v1243_v35 = vpack.c.bf16 %v199_v31, %v198_v30  ;;  %v200_v36 = vld [vmem:[#allocation6 + $0xd0] sm:$0xff] }
  0x52   :  { %1204 = vmatprep.subr.bf16.mxu0 %v1203_v8  ;;  %v201_v37 = vld [vmem:[#allocation6 + $0xd8] sm:$0xff]  ;;  %v1219_v38 = vpack.c.bf16 %v100_v34, %v99_v33  ;;  %v101_v39 = vld [vmem:[#allocation6 + $0x70] sm:$0xff]  ;;  %v202_v42 = vld [vmem:[#allocation6 + $0xe0] sm:$0xff] }
  0x53   :  { %v102_v40 = vld [vmem:[#allocation6 + $0x78] sm:$0xff]  ;;  %v1247_v41 = vpack.c.bf16 %v201_v37, %v200_v36  ;;  %v203_v43 = vld [vmem:[#allocation6 + $0xe8] sm:$0xff]  ;;  %v204_v47 = vld [vmem:[#allocation6 + $0xf0] sm:$0xff] }
  0x54   :  { %1234 = vmatpush3.bf16.msra.mxu1 %v1231_v17  ;;  %v1223_v44 = vpack.c.bf16 %v102_v40, %v101_v39  ;;  %v1251_v45 = vpack.c.bf16 %v203_v43, %v202_v42  ;;  %v86_v46 = vld [vmem:[#allocation3 + $0x8] sm:$0xff]  ;;  %v294_v50 = vld [vmem:[#allocation6 + $0x100] sm:$0xff]  ;;  %v295_v51 = vld [vmem:[#allocation6 + $0x108] sm:$0xff] }
  0x55   :  { %1206 = vmatpush3.bf16.msra.mxu0 %v1203_v8  ;;  %1236 = vmatprep.subr.bf16.mxu1 %v1235_v23  ;;  %v205_v48 = vld [vmem:[#allocation6 + $0xf8] sm:$0xff]  ;;  %v419_v52 = vld [vmem:[#allocation8 + $0x80] sm:$0xff]  ;;  %v1259_v53 = vpack.c.bf16 %v295_v51, %v294_v50  ;;  %v420_v54 = vld [vmem:[#allocation8 + $0x88] sm:$0xff] }
  0x56   :  { %1208 = vmatprep.subr.bf16.mxu0 %v1207_v20  ;;  %v1255_v49 = vpack.c.bf16 %v205_v48, %v204_v47  ;;  %v1291_v55 = vpack.c.bf16 %v420_v54, %v419_v52  ;;  %v296_v56 = vld [vmem:[#allocation6 + $0x110] sm:$0xff]  ;;  %v297_v57 = vld [vmem:[#allocation6 + $0x118] sm:$0xff]  ;;  %v298_v59 = vld [vmem:[#allocation6 + $0x120] sm:$0xff] }
  0x57   :  { %v1263_v58 = vpack.c.bf16 %v297_v57, %v296_v56  ;;  %v299_v60 = vld [vmem:[#allocation6 + $0x128] sm:$0xff]  ;;  %v300_v62 = vld [vmem:[#allocation6 + $0x130] sm:$0xff]  ;;  %v301_v63 = vld [vmem:[#allocation6 + $0x138] sm:$0xff] }
  0x58   :  { %1238 = vmatpush3.bf16.msra.mxu1 %v1235_v23  ;;  %v1267_v61 = vpack.c.bf16 %v299_v60, %v298_v59  ;;  %v1271_v0 = vpack.c.bf16 %v301_v63, %v300_v62  ;;  %v302_v1 = vld [vmem:[#allocation6 + $0x140] sm:$0xff]  ;;  %v303_v2 = vld [vmem:[#allocation6 + $0x148] sm:$0xff]  ;;  %v304_v4 = vld [vmem:[#allocation6 + $0x150] sm:$0xff] }
  0x59   :  { %1210 = vmatpush3.bf16.msra.mxu0 %v1207_v20  ;;  %1240 = vmatprep.subr.bf16.mxu1 %v1239_v29  ;;  %v1275_v3 = vpack.c.bf16 %v303_v2, %v302_v1  ;;  %v305_v5 = vld [vmem:[#allocation6 + $0x158] sm:$0xff]  ;;  %v306_v7 = vld [vmem:[#allocation6 + $0x160] sm:$0xff]  ;;  %v307_v8 = vld [vmem:[#allocation6 + $0x168] sm:$0xff] }
  0x5a   :  { %1212 = vmatprep.subr.bf16.mxu0 %v1211_v26  ;;  %v1279_v6 = vpack.c.bf16 %v305_v5, %v304_v4  ;;  %v1283_v9 = vpack.c.bf16 %v307_v8, %v306_v7  ;;  %v831_v10 = vld [vmem:[%s1723_s2] ss:$0 sm:$0xff]  ;;  %v403_v14 = vld [vmem:[#allocation8] sm:$0xff]  ;;  %v404_v15 = vld [vmem:[#allocation8 + $0x8] sm:$0xff] }
  0x5b   :  { %v421_v17 = vld [vmem:[#allocation8 + $0x90] sm:$0xff]  ;;  %v422_v18 = vld [vmem:[#allocation8 + $0x98] sm:$0xff]  ;;  %v1293_v20 = vpack.c.bf16 %v404_v15, %v403_v14  ;;  %v423_v25 = vld [vmem:[#allocation8 + $0xa0] sm:$0xff] }
  0x5c   :  { %1242 = vmatpush3.bf16.msra.mxu1 %v1239_v29  ;;  %v1295_v22 = vpack.c.bf16 %v422_v18, %v421_v17  ;;  %v405_v23 = vld [vmem:[#allocation8 + $0x10] sm:$0xff]  ;;  %v406_v24 = vld [vmem:[#allocation8 + $0x18] sm:$0xff]  ;;  %v407_v29 = vld [vmem:[#allocation8 + $0x20] sm:$0xff] }
  0x5d   :  { %1214 = vmatpush3.bf16.msra.mxu0 %v1211_v26  ;;  %1244 = vmatprep.subr.bf16.mxu1 %v1243_v35  ;;  %v424_v26 = vld [vmem:[#allocation8 + $0xa8] sm:$0xff]  ;;  %v1297_v27 = vpack.c.bf16 %v406_v24, %v405_v23  ;;  %v425_v31 = vld [vmem:[#allocation8 + $0xb0] sm:$0xff]  ;;  %v410_v36 = vld [vmem:[#allocation8 + $0x38] sm:$0xff] }
  0x5e   :  { %1216 = vmatprep.subr.bf16.mxu0 %v1215_v32  ;;  %v1299_v28 = vpack.c.bf16 %v424_v26, %v423_v25  ;;  %v408_v30 = vld [vmem:[#allocation8 + $0x28] sm:$0xff]  ;;  %v427_v37 = vld [vmem:[#allocation8 + $0xc0] sm:$0xff]  ;;  %v429_v43 = vld [vmem:[#allocation8 + $0xd0] sm:$0xff] }
  0x5f   :  { %v1301_v33 = vpack.c.bf16 %v408_v30, %v407_v29  ;;  %v412_v42 = vld [vmem:[#allocation8 + $0x48] sm:$0xff]  ;;  %v413_v47 = vld [vmem:[#allocation8 + $0x50] sm:$0xff]  ;;  %v414_v48 = vld [vmem:[#allocation8 + $0x58] sm:$0xff] }
  0x60   :  { %1246 = vmatpush3.bf16.msra.mxu1 %v1243_v35  ;;  %v409_v35 = vld [vmem:[#allocation8 + $0x30] sm:$0xff]  ;;  %v432_v50 = vld [vmem:[#allocation8 + $0xe8] sm:$0xff]  ;;  %v1313_v51 = vpack.c.bf16 %v414_v48, %v413_v47  ;;  %v309_v57 = vld [vmem:[#allocation6 + $0x178] sm:$0xff] }
  0x61   :  { %1218 = vmatpush3.bf16.msra.mxu0 %v1215_v32  ;;  %1248 = vmatprep.subr.bf16.mxu1 %v1247_v41  ;;  %v426_v32 = vld [vmem:[#allocation8 + $0xb8] sm:$0xff]  ;;  %v1305_v39 = vpack.c.bf16 %v410_v36, %v409_v35  ;;  %v416_v54 = vld [vmem:[#allocation8 + $0x68] sm:$0xff]  ;;  %v308_v56 = vld [vmem:[#allocation6 + $0x170] sm:$0xff] }
  0x62   :  { %1220 = vmatprep.subr.bf16.mxu0 %v1219_v38  ;;  %v1303_v34 = vpack.c.bf16 %v426_v32, %v425_v31  ;;  %v433_v59 = vld [vmem:[#allocation8 + $0xf0] sm:$0xff]  ;;  %v434_v60 = vld [vmem:[#allocation8 + $0xf8] sm:$0xff]  ;;  %v435_v1 = vld [vmem:[#allocation8 + $0x100] sm:$0xff] }
  0x63   :  { %v1319_v62 = vpack.c.bf16 %v434_v60, %v433_v59  ;;  %v418_v63 = vld [vmem:[#allocation8 + $0x78] sm:$0xff]  ;;  %v436_v2 = vld [vmem:[#allocation8 + $0x108] sm:$0xff]  ;;  %v833_v4 = vld [vmem:[%s1723_s2 + $0x1] ss:$0 sm:$0xff] }
  0x64   :  { %1250 = vmatpush3.bf16.msra.mxu1 %v1247_v41  ;;  %v411_v41 = vld [vmem:[#allocation8 + $0x40] sm:$0xff]  ;;  %v440_v17 = vld [vmem:[#allocation8 + $0x128] sm:$0xff]  ;;  %v612_v35 = vld [vmem:[#allocation9 + $0x10] sm:$0xff] }
  0x65   :  { %1222 = vmatpush3.bf16.msra.mxu0 %v1219_v38  ;;  %1252 = vmatprep.subr.bf16.mxu1 %v1251_v45  ;;  %v428_v38 = vld [vmem:[#allocation8 + $0xc8] sm:$0xff]  ;;  %v439_v15 = vld [vmem:[#allocation8 + $0x120] sm:$0xff]  ;;  %v613_v36 = vld [vmem:[#allocation9 + $0x18] sm:$0xff] }
  0x66   :  { %1224 = vmatprep.subr.bf16.mxu0 %v1223_v44  ;;  %v1307_v40 = vpack.c.bf16 %v428_v38, %v427_v37  ;;  %v1331_v18 = vpack.c.bf16 %v440_v17, %v439_v15  ;;  %v443_v24 = vld [vmem:[#allocation8 + $0x140] sm:$0xff]  ;;  %v444_v25 = vld [vmem:[#allocation8 + $0x148] sm:$0xff]  ;;  %v1359_v37 = vpack.c.bf16 %v613_v36, %v612_v35  ;;  %v620_v47 = vld [vmem:[#allocation9 + $0x50] sm:$0xff] }
  0x67   :  { %v1339_v26 = vpack.c.bf16 %v444_v25, %v443_v24  ;;  %v448_v29 = vld [vmem:[#allocation8 + $0x168] sm:$0xff]  ;;  %v610_v32 = vld [vmem:[#allocation9] sm:$0xff]  ;;  %v621_v48 = vld [vmem:[#allocation9 + $0x58] sm:$0xff] }
  0x68   :  { %1254 = vmatpush3.bf16.msra.mxu1 %v1251_v45  ;;  %v1309_v45 = vpack.c.bf16 %v412_v42, %v411_v41  ;;  %v614_v38 = vld [vmem:[#allocation9 + $0x20] sm:$0xff]  ;;  %v616_v41 = vld [vmem:[#allocation9 + $0x30] sm:$0xff]  ;;  %v617_v42 = vld [vmem:[#allocation9 + $0x38] sm:$0xff] }
  0x69   :  { %1226 = vmatpush3.bf16.msra.mxu0 %v1223_v44  ;;  %1256 = vmatprep.subr.bf16.mxu1 %v1255_v49  ;;  %v430_v44 = vld [vmem:[#allocation8 + $0xd8] sm:$0xff]  ;;  %v838_v35 = vld [vmem:[%s1727_s6] ss:$0 sm:$0xff] }
  0x6a   :  { %1260 = vmatprep.subr.bf16.mxu0 %v1259_v53 }
  0x6c   :  { %1018 = vmatmul.mubr.f32.vlgmr.msra.gmra.mrb[0].mxu0 %v86_v46  ;;  %1258 = vmatpush3.bf16.msra.mxu1 %v1255_v49  ;;  %v1311_v46 = vpack.c.bf16 %v430_v44, %v429_v43  ;;  %v431_v49 = vld [vmem:[#allocation8 + $0xe0] sm:$0xff]  ;;  %v1367_v43 = vpack.c.bf16 %v617_v42, %v616_v41 }
  0x6d   :  { %1292 = vmatprep.subr.bf16.mxu1 %v1291_v55  ;;  %1262 = vmatpush3.bf16.msra.mxu0 %v1259_v53  ;;  %v1315_v52 = vpack.c.bf16 %v432_v50, %v431_v49  ;;  %v415_v53 = vld [vmem:[#allocation8 + $0x60] sm:$0xff]  ;;  %v1375_v49 = vpack.c.bf16 %v621_v48, %v620_v47 }
  0x6e   :  { %1264 = vmatprep.subr.bf16.mxu0 %v1263_v58  ;;  %v1317_v55 = vpack.c.bf16 %v416_v54, %v415_v53  ;;  %v618_v44 = vld [vmem:[#allocation9 + $0x40] sm:$0xff]  ;;  %v835_v53 = vld [vmem:[%s1723_s2 + $0x2] ss:$0 sm:$0xff] }
  0x6f   :  { %v622_v50 = vld [vmem:[#allocation9 + $0x60] sm:$0xff] }
  0x71   :  { %1266 = vmatpush3.bf16.msra.mxu0 %v1263_v58  ;;  %v1287_v58 = vpack.c.bf16 %v309_v57, %v308_v56 }
  0x72   :  { %1268 = vmatprep.subr.bf16.mxu0 %v1267_v61 }
  0x75   :  { %1270 = vmatpush3.bf16.msra.mxu0 %v1267_v61  ;;  %v417_v61 = vld [vmem:[#allocation8 + $0x70] sm:$0xff] }
  0x76   :  { %1272 = vmatprep.subr.bf16.mxu0 %v1271_v0 }
  0x79   :  { %1274 = vmatpush3.bf16.msra.mxu0 %v1271_v0  ;;  %v1321_v0 = vpack.c.bf16 %v418_v63, %v417_v61 }
  0x7a   :  { %1276 = vmatprep.subr.bf16.mxu0 %v1275_v3 }
  0x7d   :  { %1278 = vmatpush3.bf16.msra.mxu0 %v1275_v3  ;;  %v1323_v3 = vpack.c.bf16 %v436_v2, %v435_v1  ;;  %v624_v2 = vld [vmem:[#allocation9 + $0x70] sm:$0xff] }
  0x7e   :  { %1280 = vmatprep.subr.bf16.mxu0 %v1279_v6 }
  0x81   :  { %1282 = vmatpush3.bf16.msra.mxu0 %v1279_v6 }
  0x82   :  { %1284 = vmatprep.subr.bf16.mxu0 %v1283_v9 }
  0x85   :  { %1286 = vmatpush3.bf16.msra.mxu0 %v1283_v9  ;;  %v437_v9 = vld [vmem:[#allocation8 + $0x110] sm:$0xff] }
  0x86   :  { %1288 = vmatprep.subr.bf16.mxu0 %v1287_v58 }
  0x89   :  { %1290 = vmatpush3.bf16.msra.mxu0 %v1287_v58 }
  0x8a   :  { %1324 = vmatprep.subr.bf16.mxu0 %v1323_v3 }
 0x13f   :  { %v1019_v11 = vpop.f32.mrb[0].mxu0 }
 0x140   :  { %v1677_v12 = vadd.f32 %v1019_v11, %v831_v10  ;;  %v176_v13 = vpop.f32.mrb[1].mxu0 }
 0x141   :  { %v1679_v16 = vadd.f32 %v831_v10, %v176_v13  ;;  %v438_v10 = vld [vmem:[#allocation8 + $0x118] sm:$0xff] }
 0x142   :  { %v186_v21 = vmax.f32 %v1677_v12, 0.0  ;;  %v1327_v14 = vpack.c.bf16 %v438_v10, %v437_v9  ;;  %v449_v12 = vld [vmem:[#allocation8 + $0x170] sm:$0xff] }
 0x143   :  { %v185_v19 = vmax.f32 %v1679_v16, 0.0  ;;  %v446_v16 = vld [vmem:[#allocation8 + $0x158] sm:$0xff] }
 0x145   :  { %1052 = vmatprep.mubr.f32.mxu1 %v185_v19 }
 0x146   :  { %1053 = vmatmul.mubr.f32.vlgmr.msra.gmra.mrb[0].mxu1 %v186_v21 }
 0x147   :  { %1294 = vmatpush3.bf16.msra.mxu1 %v1293_v20  ;;  %v441_v20 = vld [vmem:[#allocation8 + $0x130] sm:$0xff] }
 0x148   :  { %1296 = vmatprep.subr.bf16.mxu1 %v1295_v22  ;;  %v442_v22 = vld [vmem:[#allocation8 + $0x138] sm:$0xff] }
 0x149   :  { %v1335_v23 = vpack.c.bf16 %v442_v22, %v441_v20 }
 0x14b   :  { %1298 = vmatpush3.bf16.msra.mxu1 %v1297_v27  ;;  %v445_v27 = vld [vmem:[#allocation8 + $0x150] sm:$0xff] }
 0x14c   :  { %1300 = vmatprep.subr.bf16.mxu1 %v1299_v28  ;;  %v447_v28 = vld [vmem:[#allocation8 + $0x160] sm:$0xff] }
 0x14d   :  { %v1347_v30 = vpack.c.bf16 %v448_v29, %v447_v28 }
 0x14f   :  { %1302 = vmatpush3.bf16.msra.mxu1 %v1301_v33  ;;  %v611_v33 = vld [vmem:[#allocation9 + $0x8] sm:$0xff] }
 0x150   :  { %1304 = vmatprep.subr.bf16.mxu1 %v1303_v34  ;;  %v1355_v34 = vpack.c.bf16 %v611_v33, %v610_v32 }
 0x153   :  { %1306 = vmatpush3.bf16.msra.mxu1 %v1305_v39  ;;  %v615_v39 = vld [vmem:[#allocation9 + $0x28] sm:$0xff] }
 0x154   :  { %1308 = vmatprep.subr.bf16.mxu1 %v1307_v40  ;;  %v1363_v40 = vpack.c.bf16 %v615_v39, %v614_v38 }
 0x157   :  { %1310 = vmatpush3.bf16.msra.mxu1 %v1309_v45  ;;  %v619_v45 = vld [vmem:[#allocation9 + $0x48] sm:$0xff] }
 0x158   :  { %1312 = vmatprep.subr.bf16.mxu1 %v1311_v46  ;;  %v1371_v46 = vpack.c.bf16 %v619_v45, %v618_v44 }
 0x15b   :  { %1314 = vmatpush3.bf16.msra.mxu1 %v1313_v51  ;;  %v623_v51 = vld [vmem:[#allocation9 + $0x68] sm:$0xff] }
 0x15c   :  { %1316 = vmatprep.subr.bf16.mxu1 %v1315_v52  ;;  %v1379_v52 = vpack.c.bf16 %v623_v51, %v622_v50 }
 0x15f   :  { %1318 = vmatpush3.bf16.msra.mxu1 %v1317_v55 }
 0x160   :  { %1320 = vmatprep.subr.bf16.mxu1 %v1319_v62 }
 0x163   :  { %1322 = vmatpush3.bf16.msra.mxu1 %v1321_v0 }
 0x164   :  { %1356 = vmatprep.subr.bf16.mxu1 %v1355_v34 }
 0x219   :  { %v1054_v5 = vpop.f32.mrb[0].mxu1 }
 0x21a   :  { %v286_v6 = vadd.f32 %v1054_v5, %v833_v4  ;;  %v280_v7 = vpop.f32.mrb[1].mxu1  ;;  %v836_v5 = vld [vmem:[%s1725_s4] ss:$0 sm:$0xff] }
 0x21b   :  { %v281_v8 = vadd.f32 %v833_v4, %v280_v7 }
 0x21c   :  { %v290_v13 = vmax.f32 %v286_v6, 0.0 }
 0x21d   :  { %v289_v11 = vmax.f32 %v281_v8, 0.0 }
 0x21f   :  { %1087 = vmatprep.mubr.f32.mxu0 %v289_v11  ;;  %522 = vmatprep.mubr.f32.mxu1 %v289_v11 }
 0x220   :  { %1088 = vmatmul.mubr.f32.vlgmr.msra.gmra.mrb[2].mxu0 %v290_v13  ;;  %523 = vmatmul.mubr.f32.vlgmr.msra.gmra.mrb[2].mxu1 %v185_v19  ;;  %v1343_v19 = vpack.c.bf16 %v446_v16, %v445_v27 }
 0x221   :  { %527 = vmatprep.mubr.f32.mxu1 %v290_v13  ;;  %1326 = vmatpush3.bf16.msra.mxu0 %v1323_v3  ;;  %v625_v3 = vld [vmem:[#allocation9 + $0x78] sm:$0xff] }
 0x222   :  { %1328 = vmatprep.subr.bf16.mxu0 %v1327_v14  ;;  %1358 = vmatpush3.bf16.msra.mxu1 %v1355_v34  ;;  %v1383_v4 = vpack.c.bf16 %v625_v3, %v624_v2 }
 0x223   :  { %1360 = vmatprep.subr.bf16.mxu1 %v1359_v37 }
 0x224   :  { %528 = vmatmul.mubr.f32.gmra.mrb[4].mxu1 %v186_v21  ;;  %v450_v21 = vld [vmem:[#allocation8 + $0x178] sm:$0xff] }
 0x225   :  { %1330 = vmatpush3.bf16.msra.mxu0 %v1327_v14  ;;  %v1351_v31 = vpack.c.bf16 %v450_v21, %v449_v12 }
 0x226   :  { %1332 = vmatprep.subr.bf16.mxu0 %v1331_v18  ;;  %1362 = vmatpush3.bf16.msra.mxu1 %v1359_v37 }
 0x227   :  { %1364 = vmatprep.subr.bf16.mxu1 %v1363_v40 }
 0x229   :  { %1334 = vmatpush3.bf16.msra.mxu0 %v1331_v18 }
 0x22a   :  { %1336 = vmatprep.subr.bf16.mxu0 %v1335_v23  ;;  %1366 = vmatpush3.bf16.msra.mxu1 %v1363_v40 }
 0x22b   :  { %1368 = vmatprep.subr.bf16.mxu1 %v1367_v43 }
 0x22d   :  { %1338 = vmatpush3.bf16.msra.mxu0 %v1335_v23 }
 0x22e   :  { %1340 = vmatprep.subr.bf16.mxu0 %v1339_v26  ;;  %1370 = vmatpush3.bf16.msra.mxu1 %v1367_v43 }
 0x22f   :  { %1372 = vmatprep.subr.bf16.mxu1 %v1371_v46 }
 0x231   :  { %1342 = vmatpush3.bf16.msra.mxu0 %v1339_v26 }
 0x232   :  { %1344 = vmatprep.subr.bf16.mxu0 %v1343_v19  ;;  %1374 = vmatpush3.bf16.msra.mxu1 %v1371_v46 }
 0x233   :  { %1376 = vmatprep.subr.bf16.mxu1 %v1375_v49 }
 0x235   :  { %1346 = vmatpush3.bf16.msra.mxu0 %v1343_v19 }
 0x236   :  { %1348 = vmatprep.subr.bf16.mxu0 %v1347_v30  ;;  %1378 = vmatpush3.bf16.msra.mxu1 %v1375_v49 }
 0x237   :  { %1380 = vmatprep.subr.bf16.mxu1 %v1379_v52 }
 0x239   :  { %1350 = vmatpush3.bf16.msra.mxu0 %v1347_v30 }
 0x23a   :  { %1352 = vmatprep.subr.bf16.mxu0 %v1351_v31  ;;  %1382 = vmatpush3.bf16.msra.mxu1 %v1379_v52 }
 0x23b   :  { %1384 = vmatprep.subr.bf16.mxu1 %v1383_v4 }
 0x23d   :  { %1354 = vmatpush3.bf16.msra.mxu0 %v1351_v31  ;;  %v837_v31 = vld [vmem:[%s1726_s5] ss:$0 sm:$0xff] }
 0x23e   :  { %1388 = vmatprep.subr.bf16.mxu0 %v1355_v34  ;;  %1386 = vmatpush3.bf16.msra.mxu1 %v1383_v4 }
 0x2f3   :  { %v1089_v54 = vpop.f32.mrb[2].mxu0  ;;  %v925_v55 = vpop.f32.mrb[2].mxu1 }
 0x2f4   :  { %v390_v56 = vadd.f32 %v1089_v54, %v835_v53  ;;  %v384_v57 = vpop.f32.mrb[3].mxu0  ;;  %v926_v58 = vpop.f32.mrb[3].mxu1 }
 0x2f5   :  { %v385_v59 = vadd.f32 %v835_v53, %v384_v57  ;;  %v927_v60 = vadd.f32 %v926_v58, %v925_v55 }
 0x2f6   :  { %v394_v63 = vmax.f32 %v390_v56, 0.0 }
 0x2f7   :  { %v393_v61 = vmax.f32 %v385_v59, 0.0  ;;  %v928_v62 = vpop.f32.mrb[4].mxu1  ;;  %v525_v8 = vadd.f32 %v927_v60, %v836_v5 }
 0x2f8   :  { %v929_v0 = vpop.f32.mrb[5].mxu1 }
 0x2f9   :  { %v930_v1 = vadd.f32 %v929_v0, %v928_v62  ;;  %1122 = vmatprep.mubr.f32.mxu0 %v393_v61 }
 0x2fa   :  { %1123 = vmatmul.mubr.f32.vlgmr.msra.gmra.mrb[4].mxu0 %v394_v63 }
 0x2fb   :  { %1390 = vmatpush3.bf16.msra.mxu0 %v1355_v34  ;;  %v530_v6 = vadd.f32 %v930_v1, %v836_v5 }
 0x2fc   :  { %1392 = vmatprep.subr.bf16.mxu0 %v1359_v37 }
 0x2ff   :  { %1394 = vmatpush3.bf16.msra.mxu0 %v1359_v37 }
 0x300   :  { %1396 = vmatprep.subr.bf16.mxu0 %v1363_v40 }
 0x303   :  { %1398 = vmatpush3.bf16.msra.mxu0 %v1363_v40 }
 0x304   :  { %1400 = vmatprep.subr.bf16.mxu0 %v1367_v43 }
 0x307   :  { %1402 = vmatpush3.bf16.msra.mxu0 %v1367_v43 }
 0x308   :  { %1404 = vmatprep.subr.bf16.mxu0 %v1371_v46 }
 0x30b   :  { %1406 = vmatpush3.bf16.msra.mxu0 %v1371_v46 }
 0x30c   :  { %1408 = vmatprep.subr.bf16.mxu0 %v1375_v49 }
 0x30f   :  { %1410 = vmatpush3.bf16.msra.mxu0 %v1375_v49 }
 0x310   :  { %1412 = vmatprep.subr.bf16.mxu0 %v1379_v52 }
 0x313   :  { %1414 = vmatpush3.bf16.msra.mxu0 %v1379_v52 }
 0x314   :  { %1416 = vmatprep.subr.bf16.mxu0 %v1383_v4 }
 0x317   :  { %1418 = vmatpush3.bf16.msra.mxu0 %v1383_v4 }
 0x3cd   :  { %v1124_v7 = vpop.f32.mrb[4].mxu0 }
 0x3ce   :  { %v605_v9 = vadd.f32 %v1124_v7, %v530_v6  ;;  %v599_v10 = vpop.f32.mrb[5].mxu0 }
 0x3cf   :  { %v600_v11 = vadd.f32 %v599_v10, %v525_v8 }
 0x3d0   :  { %v609_v13 = vmax.f32 %v605_v9, 0.0 }
 0x3d1   :  { %v608_v14 = vmax.f32 %v600_v11, 0.0 }
 0x3d2   :  { %v702_v17 = vmul.f32 %v609_v13, %v609_v13 }
 0x3d3   :  { %1157 = vmatprep.mubr.f32.mxu1 %v608_v14  ;;  %v701_v15 = vmul.f32 %v608_v14, %v608_v14 }
 0x3d4   :  { %1158 = vmatmul.mubr.f32.vlgmr.msra.gmra.mrb[6].mxu1 %v609_v13 }
 0x3d5   :  { %1192 = vmatprep.mubr.f32.mxu0 %v701_v15 }
 0x3d6   :  { %1193 = vmatmul.mubr.f32.vlgmr.msra.gmra.mrb[6].mxu0 %v702_v17 }
 0x4a7   :  { %v1159_v18 = vpop.f32.mrb[6].mxu1 }
 0x4a8   :  { %v779_v20 = vmul.f32 %v1159_v18, %v1159_v18  ;;  %v692_v22 = vpop.f32.mrb[7].mxu1  ;;  %v785_v30 = vsub.f32 %v609_v13, %v1159_v18 }
 0x4a9   :  { %v778_v23 = vmul.f32 %v692_v22, %v692_v22  ;;  %v1194_v24 = vpop.f32.mrb[6].mxu0  ;;  %v784_v21 = vsub.f32 %v608_v14, %v692_v22 }
 0x4aa   :  { %v781_v25 = vsub.f32 %v1194_v24, %v779_v20  ;;  %v769_v26 = vpop.f32.mrb[7].mxu0 }
 0x4ab   :  { %v780_v27 = vsub.f32 %v769_v26, %v778_v23 }
 0x4ac   :  { %v783_v16 = vmax.f32 %v781_v25, 0.0 }
 0x4ad   :  { %v782_v19 = vmax.f32 %v780_v27, 0.0 }
 0x4ae   :  { %v787_v28 = vadd.f32 1e-05, %v783_v16 }
 0x4af   :  { %v786_v29 = vadd.f32 1e-05, %v782_v19 }
 0x4b0   :  { %1426 = vrsqrt.f32 %v787_v28 }
 0x4b1   :  { %1428 = vrsqrt.f32 %v786_v29 }
 0x4ba   :  { %v1427_v12 = vpop.eup %1426 }
 0x4bb   :  { %v1429_v32 = vpop.eup %1428  ;;  %v791_v33 = vmul.f32 %v1427_v12, %v785_v30 }
 0x4bc   :  { %v790_v34 = vmul.f32 %v1429_v32, %v784_v21 }
 0x4bd   :  { %v800_v36 = vmul.f32 %v837_v31, %v791_v33 }
 0x4be   :  { %v799_v37 = vmul.f32 %v837_v31, %v790_v34 }
 0x4bf   :  { %v809_v38 = vadd.f32 %v838_v35, %v800_v36 }
 0x4c0   :  { %v808_v39 = vadd.f32 %v838_v35, %v799_v37 }
 0x4c1   :  { %811 = vst [vmem:[#allocation11 + $0x8] sm:$0xff] %v809_v38 }
 0x4c2   :  { %810 = vst [vmem:[#allocation11] sm:$0xff] %v808_v39 }
 0x4c3   :  { %1529 = shalt.err (!%p1526_p8)
}
 0x4c4   :  { %s1530_s6 = scalar_lea.hbm %s1729_s8, 256 }
 0x4c5   :  { %p1531_p9 = scmp.ne.s32.totalorder %s1729_s8, %s1530_s6  ;;  %p1534_p10 = scmp.lt.u32.totalorder %s1530_s6, %s1729_s8 }
 0x4c7   :  { %p1536_p11 = pnand %p1534_p10, %p1531_p9 }
 0x4c9   :  { %1539 = shalt.err (!%p1536_p11)
}
 0x4ca   :  { %823 = dma.vmem_to_hbm [thread:$0]  %s818_s0, 256, %s1729_s8, [#allocation5], %s1550_s17, %s1550_s17, %s1551_s18  }
 0x4cb   :  { %1546 = dma.done.wait [#allocation5], 256  }
 0x4cc   :  { %1547 = vsyncadd [#allocation5], 4294967040 }
 0x4cd   :  { %827 = vsyncpa [#allocation4], 1 }
 0x4ce   :  { %828 = vsyncpa [#allocation7], 1 }
 0x4cf   :  { %829 = vsyncpa [#allocation10], 1 }
 0x4d0   :  { %830 = vsyncpa [#allocation5], 1 }

</bundles_post_ra>
